<compile_context>
chip_gen: v7x
topology: tpu7x:2x2x1
jax: 0.10.0
libtpu: 0.0.40
codegen_flags: <defaults>
</compile_context>

<pallas_src>
import functools

import jax
import jax.numpy as jnp
from jax.experimental import pallas as pl
from jax.experimental.pallas import tpu as pltpu


# ----------------------------------------------------------------------------
# Pallas kernel: fused  model-forward (matmul)  +  MSE reduction
#   -> per-parallel-slice partial sums (summed / normalized in the wrapper)
# ----------------------------------------------------------------------------
def _model_mse_kernel(x_ref, wt_ref, t_ref, part_ref, mm_ref, *,
                      n_rows, n_cols, tile_n, tile_f, tiles_per_slice,
                      needs_row_mask, needs_col_mask, mxu_bf16):
    # x_ref    : (tile_n, tile_f) VMEM   (streamed, double-buffered)
    # wt_ref   : (O, tile_f)      VMEM   (lane-dense transposed weight)
    # t_ref    : (tile_n, O)      VMEM
    # part_ref : (1, 1)           SMEM   per-parallel-slice partial sum (output)
    # mm_ref   : (tile_n, O) f32  VMEM   matmul accumulator over the F axis
    p = pl.program_id(0)       # parallel slice (megacore on v7x)
    i = pl.program_id(1)       # row tile within the slice (reduction)
    kf = pl.program_id(2)      # F tile (reduction)
    nf = pl.num_programs(2)

    @pl.when(jnp.logical_and(i == 0, kf == 0))
    def _init_partial():
        part_ref[0, 0] = jnp.float32(0.0)

    @pl.when(kf == 0)
    def _init_mm():
        mm_ref[...] = jnp.zeros_like(mm_ref)

    x = x_ref[...]
    w = wt_ref[...]
    if needs_col_mask:
        # Zero garbage columns of a partially out-of-bounds last F tile so they
        # cannot pollute the contraction (only emitted when F % tile_f != 0).
        col = kf * tile_f + jax.lax.broadcasted_iota(jnp.int32, (1, tile_f), 1)
        x = jnp.where(col < n_cols, x, jnp.zeros((), x.dtype))
    if mxu_bf16:
        # Optional single-pass MXU matmul (v7x headroom); f32 accumulation.
        x = x.astype(jnp.bfloat16)
        w = w.astype(jnp.bfloat16)
    elif x.dtype != w.dtype:
        x = x.astype(jnp.float32)
        w = w.astype(jnp.float32)

    # out[n, o] = sum_f x[n, f] * wT[o, f]   ("nt" matmul, f32 accumulation)
    mm_ref[...] += jax.lax.dot_general(
        x, w,
        dimension_numbers=(((1,), (1,)), ((), ())),
        preferred_element_type=jnp.float32)

    @pl.when(kf == nf - 1)
    def _reduce():
        diff = mm_ref[...] - t_ref[...].astype(jnp.float32)
        sq = diff * diff
        if needs_row_mask:
            # (tile_n, 1) iota mask, broadcast over O; zeroes garbage rows of a
            # partial / duplicated tail tile (only emitted when needed).
            row = (p * tiles_per_slice + i) * tile_n + jax.lax.broadcasted_iota(
                jnp.int32, (tile_n, 1), 0)
            sq = jnp.where(row < n_rows, sq, jnp.float32(0.0))
        part_ref[0, 0] += jnp.sum(sq)


# ----------------------------------------------------------------------------
# Generation-aware tiling
# ----------------------------------------------------------------------------
def _vmem_capacity_bytes():
    try:
        return int(pltpu.get_tpu_info().vmem_capacity_bytes)
    except Exception:
        return 64 << 20   # conservative fallback: v7x physical VMEM per TC


def _choose_tiles(n, f, itemsize, vmem_phys):
    """Pick (tile_n, tile_f) so that the double-buffered x stream plus the
    other resident buffers stay under ~60% of physical VMEM."""
    total_budget = int(vmem_phys * 0.6)
    x_buf_budget = total_budget // 3          # bytes for ONE x buffer (x2 buffers)

    # tile_f: full F if an 8-row tile fits; else largest 128-multiple that does.
    if f <= 128 or f * 8 * itemsize <= x_buf_budget:
        tile_f = f
    else:
        tile_f = max(128, (x_buf_budget // (8 * itemsize) // 128) * 128)
        tile_f = min(tile_f, f)

    # tile_n: as many rows as fit, multiple of 8 (or == N when N < 8),
    # capped at 2048 (per-step overhead amortization, diminishing returns).
    if n < 8:
        tile_n = n
    else:
        t = x_buf_budget // (tile_f * itemsize)
        t = (t // 8) * 8
        tile_n = max(8, min(t, 2048, (n // 8) * 8))
    return int(tile_n), int(tile_f)


# ----------------------------------------------------------------------------
# Fused model(inputs) -> MSE(., targets) wrapper
# ----------------------------------------------------------------------------
def model_mse_loss(x_flat, weight_t, targets, *, mxu_bf16=False):
    """x_flat: (N, F) flattened NCHW inputs; weight_t: (O, F); targets: (N, O)."""
    N, F = x_flat.shape
    O, F2 = weight_t.shape
    assert F == F2 and targets.shape == (N, O)

    vmem_phys = _vmem_capacity_bytes()
    tile_n, tile_f = _choose_tiles(N, F, x_flat.dtype.itemsize, vmem_phys)

    n_row_tiles = pl.cdiv(N, tile_n)
    n_f_tiles = pl.cdiv(F, tile_f)

    # Two parallel slices so both v7x TensorCores each stream half the rows;
    # near-zero cost on single-core v5e / v6e.
    num_slices = 2 if n_row_tiles >= 2 else 1
    tiles_per_slice = pl.cdiv(n_row_tiles, num_slices)
    over_allocated = num_slices * tiles_per_slice != n_row_tiles

    needs_row_mask = num_slices * tiles_per_slice * tile_n != N
    needs_col_mask = n_f_tiles * tile_f != F

    def row_block(p, i):
        gt = p * tiles_per_slice + i
        if over_allocated:
            gt = jnp.minimum(gt, n_row_tiles - 1)   # clamp duplicated tail tiles
        return gt

    kernel = functools.partial(
        _model_mse_kernel,
        n_rows=N, n_cols=F, tile_n=tile_n, tile_f=tile_f,
        tiles_per_slice=tiles_per_slice,
        needs_row_mask=needs_row_mask, needs_col_mask=needs_col_mask,
        mxu_bf16=mxu_bf16)

    cost = pl.CostEstimate(
        flops=2 * N * F * O + 3 * N * O,
        transcendentals=0,
        bytes_accessed=int(
            x_flat.size * x_flat.dtype.itemsize
            + weight_t.size * weight_t.dtype.itemsize * num_slices * tiles_per_slice
            + targets.size * targets.dtype.itemsize
            + num_slices * 4),
    )

    # TODO(synk): sweep pipeline_mode=pl.Buffered(3) on the x stream on v7x if
    # the profile shows exposed DMA ramp at step boundaries.
    partials = pl.pallas_call(
        kernel,
        out_shape=jax.ShapeDtypeStruct((num_slices, 1), jnp.float32),
        grid_spec=pltpu.PrefetchScalarGridSpec(
            num_scalar_prefetch=0,
            grid=(num_slices, tiles_per_slice, n_f_tiles),
            in_specs=[
                # x stream (dominant HBM traffic; double-buffered by Pallas).
                pl.BlockSpec((tile_n, tile_f),
                             lambda p, i, kf: (row_block(p, i), kf)),
                # lane-dense transposed weight; pinned when n_f_tiles == 1.
                pl.BlockSpec((O, tile_f), lambda p, i, kf: (0, kf)),
                # targets stream.
                pl.BlockSpec((tile_n, O),
                             lambda p, i, kf: (row_block(p, i), 0)),
            ],
            out_specs=pl.BlockSpec((1, 1), lambda p, i, kf: (p, 0),
                                   memory_space=pltpu.SMEM),
            scratch_shapes=[pltpu.VMEM((tile_n, O), jnp.float32)],
        ),
        compiler_params=pltpu.CompilerParams(
            dimension_semantics=("parallel", "arbitrary", "arbitrary"),
            vmem_limit_bytes=min(int(vmem_phys * 0.9), 96 * 1024 * 1024),
        ),
        cost_estimate=cost,
    )(x_flat, weight_t, targets)

    # Tiny final reduction + normalization (true element count) in plain JAX.
    return jnp.sum(partials) / jnp.float32(N * O)


# ----------------------------------------------------------------------------
# Synthetic deterministic model (the loss module takes `model` as an argument)
# ----------------------------------------------------------------------------
class LinearIMGModel:
    """model(inputs): NCHW -> flatten -> linear -> (N, 4)."""

    def __init__(self, weight):
        # Weight stored transposed (O, F): lane-dense layout for the kernel.
        self.weight_t = weight.T  # (4, C*H*W)

    def __call__(self, x_nchw):
        n = x_nchw.shape[0]
        return x_nchw.reshape(n, -1) @ self.weight_t.T

    def fused_mse(self, x_nchw, targets):
        n = x_nchw.shape[0]
        return model_mse_loss(x_nchw.reshape(n, -1), self.weight_t, targets)


# ----------------------------------------------------------------------------
# JAX port of DistanceLossIMG
# ----------------------------------------------------------------------------
class DistanceLossIMG:
    def __init__(self, lambda_data, lambda_physics, lambda_bc, n_collocation=1000,
                 mean_input=None, std_input=None, mean_target=None, std_target=None):
        if lambda_data < 0.0 or lambda_physics < 0.0 or lambda_bc < 0.0:
            raise ValueError('Lambda weights must be non-negative.')
        self.lambda_data = lambda_data
        self.lambda_physics = lambda_physics
        self.lambda_bc = lambda_bc
        self.n_collocation = n_collocation
        self.mean_input = 0.0 if mean_input is None else mean_input
        self.std_input = 1.0 if std_input is None else std_input
        self.mean_target = 0.0 if mean_target is None else mean_target
        self.std_target = 1.0 if std_target is None else std_target

    def forward(self, model, inputs, targets, physics_data=None):
        if self.lambda_physics == 0.0:
            # total_loss = MSELoss()(model(inputs), targets)  — fused Pallas kernel
            total_loss = model.fused_mse(inputs, targets)
        else:
            # TODO(synk): physics / BC branches rely on torch.autograd.grad w.r.t.
            # sliced non-leaf tensors and a mis-called helper; not translatable.
            raise NotImplementedError(
                "physics/bc branches of DistanceLossIMG are not runnable as written")
        return total_loss

    __call__ = forward


# ----------------------------------------------------------------------------
if __name__ == "__main__":
    key = jax.random.PRNGKey(0)
    k_in, k_tgt, k_w = jax.random.split(key, 3)

    N, C, H, W = 2, 4, 16, 16     # NCHW, small shapes
    O = 4                         # model output dim (loss code slices outputs 0..3)

    inputs = jax.random.normal(k_in, (N, C, H, W), dtype=jnp.float32)
    targets = jax.random.normal(k_tgt, (N, O), dtype=jnp.float32)
    weight = jax.random.normal(k_w, (C * H * W, O), dtype=jnp.float32) * 0.02

    model = LinearIMGModel(weight)
    loss_fn = DistanceLossIMG(lambda_data=1.0, lambda_physics=0.0, lambda_bc=0.0)

    loss = loss_fn(model, inputs, targets)
    loss = jax.block_until_ready(loss)

    # Reference in plain JAX.
    ref = jnp.mean((inputs.reshape(N, -1) @ weight - targets) ** 2)
    assert jnp.allclose(loss, ref, rtol=1e-3, atol=1e-3), (loss, ref)

    print("KERNEL_OK")
</pallas_src>

<mosaic_0001>
module attributes {stable_mosaic.version = 11 : i64} {
  func.func @_model_mse_kernel(%arg0: i32, %arg1: i32, %arg2: i32, %arg3: memref<2x1024xf32, #tpu.memory_space<vmem>>, %arg4: memref<4x1024xf32, #tpu.memory_space<vmem>>, %arg5: memref<2x4xf32, #tpu.memory_space<vmem>>, %arg6: memref<1x1xf32, #tpu.memory_space<smem>>, %arg7: memref<2x4xf32, #tpu.memory_space<vmem>>) attributes {dimension_semantics = [#tpu.dimension_semantics<parallel>, #tpu.dimension_semantics<arbitrary>, #tpu.dimension_semantics<arbitrary>], iteration_bounds = array<i64: 1, 1, 1>, scalar_prefetch = 0 : i64, scratch_operands = 1 : i64, tpu.core_type = #tpu.core_type<tc>, window_params = [{transform_indices = @transform_0, window_bounds = array<i64: 2, 1024>}, {transform_indices = @transform_1, window_bounds = array<i64: 4, 1024>}, {transform_indices = @transform_2, window_bounds = array<i64: 2, 4>}, {transform_indices = @transform_3, window_bounds = array<i64: 1, 1>}]} {
    %c0_i32 = arith.constant 0 : i32
    %0 = arith.cmpi eq, %arg1, %c0_i32 : i32
    %c0_i32_0 = arith.constant 0 : i32
    %1 = arith.cmpi eq, %arg2, %c0_i32_0 : i32
    %2 = arith.andi %0, %1 : i1
    %3 = arith.extui %2 : i1 to i32
    %c0_i32_1 = arith.constant 0 : i32
    %4 = arith.cmpi ne, %3, %c0_i32_1 : i32
    scf.if %4 {
      %cst_13 = arith.constant 0.000000e+00 : f32
      %c0_14 = arith.constant 0 : index
      %c0_15 = arith.constant 0 : index
      %17 = memref.load %arg6[%c0_14, %c0_15] : memref<1x1xf32, #tpu.memory_space<smem>>
      memref.store %cst_13, %arg6[%c0_14, %c0_15] : memref<1x1xf32, #tpu.memory_space<smem>>
    } else {
    }
    %c0_i32_2 = arith.constant 0 : i32
    %5 = arith.cmpi eq, %arg2, %c0_i32_2 : i32
    %6 = arith.extui %5 : i1 to i32
    %c0_i32_3 = arith.constant 0 : i32
    %7 = arith.cmpi ne, %6, %c0_i32_3 : i32
    scf.if %7 {
      %cst_13 = arith.constant 0.000000e+00 : f32
      %17 = vector.broadcast %cst_13 : f32 to vector<2x4xf32>
      %c0_14 = arith.constant 0 : index
      %c0_15 = arith.constant 0 : index
      %18 = vector.load %arg7[%c0_14, %c0_15] : memref<2x4xf32, #tpu.memory_space<vmem>>, vector<2x4xf32>
      tpu.vector_store %arg7[%c0_14, %c0_15], %17 {strides = array<i32>} : memref<2x4xf32, #tpu.memory_space<vmem>>, vector<2x4xf32>,
    } else {
    }
    %c0 = arith.constant 0 : index
    %c0_4 = arith.constant 0 : index
    %8 = vector.load %arg3[%c0, %c0_4] : memref<2x1024xf32, #tpu.memory_space<vmem>>, vector<2x1024xf32>
    %c0_5 = arith.constant 0 : index
    %c0_6 = arith.constant 0 : index
    %9 = vector.load %arg4[%c0_5, %c0_6] : memref<4x1024xf32, #tpu.memory_space<vmem>>, vector<4x1024xf32>
    %c0_7 = arith.constant 0 : index
    %c0_8 = arith.constant 0 : index
    %10 = vector.load %arg7[%c0_7, %c0_8] : memref<2x4xf32, #tpu.memory_space<vmem>>, vector<2x4xf32>
    %cst = arith.constant dense<0.000000e+00> : vector<2x4xf32>
    %11 = tpu.matmul %8, %9, %cst {dimension_numbers = #tpu.dot_dimension_numbers<[1], [1], [0], [0], [0, 0, 1, 0], [], []>} : vector<2x1024xf32>, vector<4x1024xf32>, vector<2x4xf32> -> vector<2x4xf32>
    %12 = arith.addf %10, %11 : vector<2x4xf32>
    %c0_9 = arith.constant 0 : index
    %c0_10 = arith.constant 0 : index
    %13 = vector.load %arg7[%c0_9, %c0_10] : memref<2x4xf32, #tpu.memory_space<vmem>>, vector<2x4xf32>
    tpu.vector_store %arg7[%c0_9, %c0_10], %12 {strides = array<i32>} : memref<2x4xf32, #tpu.memory_space<vmem>>, vector<2x4xf32>,
    %c0_i32_11 = arith.constant 0 : i32
    %14 = arith.cmpi eq, %arg2, %c0_i32_11 : i32
    %15 = arith.extui %14 : i1 to i32
    %c0_i32_12 = arith.constant 0 : i32
    %16 = arith.cmpi ne, %15, %c0_i32_12 : i32
    scf.if %16 {
      %c0_13 = arith.constant 0 : index
      %c0_14 = arith.constant 0 : index
      %17 = vector.load %arg7[%c0_13, %c0_14] : memref<2x4xf32, #tpu.memory_space<vmem>>, vector<2x4xf32>
      %c0_15 = arith.constant 0 : index
      %c0_16 = arith.constant 0 : index
      %18 = vector.load %arg5[%c0_15, %c0_16] : memref<2x4xf32, #tpu.memory_space<vmem>>, vector<2x4xf32>
      %19 = arith.subf %17, %18 : vector<2x4xf32>
      %20 = arith.mulf %19, %19 : vector<2x4xf32>
      %c0_17 = arith.constant 0 : index
      %c0_18 = arith.constant 0 : index
      %21 = memref.load %arg6[%c0_17, %c0_18] : memref<1x1xf32, #tpu.memory_space<smem>>
      %22 = vector.shape_cast %20 : vector<2x4xf32> to vector<1x2x4xf32>
      %cst_19 = arith.constant dense<0.000000e+00> : vector<1xf32>
      %23 = vector.multi_reduction <add>, %22, %cst_19 [1, 2] : vector<1x2x4xf32> to vector<1xf32>
      %24 = vector.shape_cast %23 : vector<1xf32> to vector<1x1x1xf32>
      %25 = vector.extract %24[0, 0, 0] : f32 from vector<1x1x1xf32>
      %26 = arith.addf %21, %25 : f32
      %c0_20 = arith.constant 0 : index
      %c0_21 = arith.constant 0 : index
      %27 = memref.load %arg6[%c0_20, %c0_21] : memref<1x1xf32, #tpu.memory_space<smem>>
      memref.store %26, %arg6[%c0_20, %c0_21] : memref<1x1xf32, #tpu.memory_space<smem>>
    } else {
    }
    return
  }
  func.func @transform_0(%arg0: i32, %arg1: i32, %arg2: i32) -> (i32, i32) {
    %c1_i32 = arith.constant 1 : i32
    %0 = arith.muli %arg0, %c1_i32 : i32
    %1 = arith.addi %0, %arg1 : i32
    %c0_i32 = arith.constant 0 : i32
    return %1, %arg2 : i32, i32
  }
  func.func @transform_1(%arg0: i32, %arg1: i32, %arg2: i32) -> (i32, i32) {
    %c0_i32 = arith.constant 0 : i32
    %c0_i32_0 = arith.constant 0 : i32
    return %c0_i32, %arg2 : i32, i32
  }
  func.func @transform_2(%arg0: i32, %arg1: i32, %arg2: i32) -> (i32, i32) {
    %c1_i32 = arith.constant 1 : i32
    %0 = arith.muli %arg0, %c1_i32 : i32
    %1 = arith.addi %0, %arg1 : i32
    %c0_i32 = arith.constant 0 : i32
    %c0_i32_0 = arith.constant 0 : i32
    return %1, %c0_i32 : i32, i32
  }
  func.func @transform_3(%arg0: i32, %arg1: i32, %arg2: i32) -> (i32, i32) {
    %c0_i32 = arith.constant 0 : i32
    %c0_i32_0 = arith.constant 0 : i32
    return %arg0, %c0_i32 : i32, i32
  }
}

</mosaic_0001>

<bundles_post_ra>
// kernel: tpu_custom_call.1
= control target key start
LH: loop header
LB: loop body
LE: loop exit
PB: predicated region body
PF: predicated region fallthrough
CT: control target
= control target key end

     0   :  { %8 = vsyncpa [#allocation4], 0  ;;  %s603_s0 = inlined_call_operand.hbm [shape: f32[2,1024], index: 0, kind: input, shape index: {}]   ;;  %s604_s1 = inlined_call_operand.hbm [shape: f32[4,1024], index: 1, kind: input, shape index: {}]   ;;  %s605_s2 = inlined_call_operand.vmem [shape: f32[2,4], index: 2, kind: input, shape index: {}]   ;;  %s606_s3 = inlined_call_operand.hbm [shape: f32[1,1], index: 3, kind: output, shape index: {}]  }
   0x1   :  { %9 = vsyncpa [#allocation7], 0 }
   0x2   :  { %10 = vsyncpa [#allocation5], 0  ;;  %s536_s12 = smov [#allocation3]   ;;  %s537_s14 = smov [#allocation6]  }
   0x3   :  { %s21_s13 = sshll.u32 %s536_s12, 4  ;;  %s31_s15 = sshll.u32 %s537_s14, 4  ;;  %s22_s13 = int_to_ptr.vmem [resolvable:$true] %s21_s13  ;;  %s32_s15 = int_to_ptr.vmem [resolvable:$true] %s31_s15 }
   0x4   :  { %s476_s18 = scalar_lea.hbm %s603_s0, 256 }
   0x5   :  { %p477_p0 = scmp.ne.s32.totalorder %s603_s0, %s476_s18  ;;  %p480_p1 = scmp.lt.u32.totalorder %s476_s18, %s603_s0 }
   0x7   :  { %p482_p2 = pnand %p480_p1, %p477_p0 }
   0x9   :  { %485 = shalt.err (!%p482_p2)
}
   0xa   :  { %s486_s23 = scalar_lea.vmem %s22_s13, 256  ;;  %p491_p4 = scmp.lt.s32.totalorder %s22_s13, %s22_s13 }
   0xb   :  { %p487_p3 = scmp.ne.s32.totalorder %s22_s13, %s486_s23  ;;  %p492_p5 = scmp.lt.s32.totalorder %s486_s23, %s486_s23 }
   0xd   :  { %p493_p6 = por %p492_p5, %p491_p4 }
   0xf   :  { %p494_p7 = pnand %p493_p6, %p487_p3 }
  0x11   :  { %497 = shalt.err (!%p494_p7)
}
  0x12   :  { %24 = dma.hbm_to_vmem [thread:$0]  %s603_s0, 256, %s22_s13, [#allocation4]  }
  0x13   :  { %s498_s28 = scalar_lea.hbm %s604_s1, 512 }
  0x14   :  { %p499_p8 = scmp.ne.s32.totalorder %s604_s1, %s498_s28  ;;  %p502_p9 = scmp.lt.u32.totalorder %s498_s28, %s604_s1 }
  0x16   :  { %p504_p10 = pnand %p502_p9, %p499_p8 }
  0x18   :  { %507 = shalt.err (!%p504_p10)
}
  0x19   :  { %s508_s6 = scalar_lea.vmem %s32_s15, 512  ;;  %p513_p12 = scmp.lt.s32.totalorder %s32_s15, %s32_s15 }
  0x1a   :  { %p509_p11 = scmp.ne.s32.totalorder %s32_s15, %s508_s6  ;;  %p514_p13 = scmp.lt.s32.totalorder %s508_s6, %s508_s6 }
  0x1c   :  { %p515_p0 = por %p514_p13, %p513_p12 }
  0x1e   :  { %p516_p1 = pnand %p515_p0, %p509_p11 }
  0x20   :  { %519 = shalt.err (!%p516_p1)
}
  0x21   :  { %34 = dma.hbm_to_vmem [thread:$0]  %s604_s1, 512, %s32_s15, [#allocation7]  }
  0x22   :  { %530 = dma.done.wait [#allocation4], 256  }
  0x23   :  { %531 = vsyncadd [#allocation4], 4294967040 }
  0x24   :  { %532 = dma.done.wait [#allocation7], 512  }
  0x25   :  { %533 = vsyncadd [#allocation7], 4294966784  ;;  %v87_v0 = vlaneseq  ;;  %v538_v1 = vmov 1983009808   ;;  %v76_v6 = vld [vmem:[#allocation6] sm:$0xff]  ;;  %v77_v7 = vld [vmem:[#allocation6 + $0x8] sm:$0xff] }
  0x26   :  { %v85_v2 = vunpack.c.l.s4 %v538_v1  ;;  %v74_v8 = vld [vmem:[#allocation3] sm:$0xff]  ;;  %v129_v9 = vcombine.high %v76_v6, %v76_v6  ;;  %v130_v10 = vcombine.high %v77_v7, %v77_v7  ;;  %v79_v14 = vld [vmem:[#allocation6 + $0x18] sm:$0xff]  ;;  %vm72_vm0 = vcmask 25600   ;;  %v424_v40 = vld [vmem:[%s605_s2] sm:$0x3]  ;;  %s520_s2 = scalar_lea.hbm %s606_s3, 16 }
  0x27   :  { %v88_v3 = vshrl.u32 %v87_v0, 7  ;;  %v83_v12 = vcombine.high %v74_v8, %v74_v8  ;;  %v78_v13 = vld [vmem:[#allocation6 + $0x10] sm:$0xff]  ;;  %v75_v15 = vld [vmem:[#allocation3 + $0x8] sm:$0xff]  ;;  %v132_v17 = vcombine.high %v79_v14, %v79_v14  ;;  %v539_v26 = vmov 0.0   ;;  %p521_p2 = scmp.ne.s32.totalorder %s606_s3, %s520_s2  ;;  %p524_p3 = scmp.lt.u32.totalorder %s520_s2, %s606_s3 }
  0x28   :  { %v86_v4 = vunpack.c.0.s8 %v85_v2  ;;  %v131_v16 = vcombine.high %v78_v13, %v78_v13  ;;  %v100_v19 = vcombine.high %v75_v15, %v75_v15  ;;  %137 = vmatprep.subr.mxu0 %v129_v9  ;;  %207 = vmatprep.subr.mxu1 %v130_v10  ;;  %73 = vst.msk [vmem:[#allocation2] sm:$0x3] %vm72_vm0, %v539_v26 }
  0x29   :  { %138 = vmatpush1.xpose.msra.mxu0 %v76_v6  ;;  %208 = vmatpush1.xpose.msra.mxu1 %v77_v7  ;;  %p526_p4 = pnand %p524_p3, %p521_p2 }
  0x2a   :  { %v89_v5 = vsub.s32 %v86_v4, %v88_v3  ;;  %277 = vmatprep.subr.mxu0 %v131_v16  ;;  %347 = vmatprep.subr.mxu1 %v132_v17 }
  0x2c   :  { %v90_v11 = vrot.slane %v74_v8, %v89_v5  ;;  %v107_v18 = vrot.slane %v75_v15, %v89_v5  ;;  %v97_v21 = vrot.slane %v83_v12, %v89_v5  ;;  %v114_v22 = vrot.slane %v100_v19, %v89_v5 }
  0x2e   :  { %v98_v20 = vcombine.high %v90_v11, %v90_v11  ;;  %v99_v23 = vcombine.high %v97_v21, %v97_v21  ;;  %v115_v24 = vcombine.high %v107_v18, %v107_v18  ;;  %v116_v25 = vcombine.high %v114_v22, %v114_v22 }
  0x2f   :  { %v80_v37 = vld [vmem:[#allocation2] sm:$0x3] }
  0x30   :  { %201 = vmatprep.mubr.f32.mxu0 %v98_v20  ;;  %271 = vmatprep.mubr.f32.mxu1 %v99_v23 }
  0x31   :  { %202 = vmatmul.mubr.f32.vlgmr.msra.gmra.mrb[0].mxu0 %v90_v11  ;;  %272 = vmatmul.mubr.f32.vlgmr.msra.gmra.mrb[0].mxu1 %v97_v21 }
  0x32   :  { %278 = vmatpush1.xpose.msra.mxu0 %v78_v13  ;;  %341 = vmatprep.mubr.f32.mxu0 %v115_v24 }
  0x33   :  { %348 = vmatpush1.xpose.msra.mxu1 %v79_v14  ;;  %411 = vmatprep.mubr.f32.mxu1 %v116_v25 }
  0x35   :  { %342 = vmatmul.mubr.f32.vlgmr.msra.gmra.mrb[2].mxu0 %v107_v18 }
  0x36   :  { %412 = vmatmul.mubr.f32.vlgmr.msra.gmra.mrb[2].mxu1 %v114_v22 }
 0x104   :  { %v203_v27 = vpop.f32.mrb[0].mxu0  ;;  %v273_v29 = vpop.f32.mrb[0].mxu1 }
 0x105   :  { %v205_v28 = vpop.f32.mrb[1].mxu0  ;;  %v274_v30 = vadd.f32 %v273_v29, %v203_v27  ;;  %v275_v31 = vpop.f32.mrb[1].mxu1 }
 0x108   :  { %v343_v32 = vpop.f32.mrb[2].mxu0 }
 0x109   :  { %v344_v33 = vadd.f32 %v343_v32, %v274_v30  ;;  %v345_v34 = vpop.f32.mrb[3].mxu0  ;;  %v413_v35 = vpop.f32.mrb[2].mxu1 }
 0x10a   :  { %v415_v36 = vpop.f32.mrb[3].mxu1 }
 0x10b   :  { %v414_v38 = vadd.f32 %v413_v35, %v344_v33 }
 0x10d   :  { %v417_v39 = vadd.f32 %v414_v38, %v80_v37 }
 0x10f   :  { %419 = vst.msk [vmem:[#allocation2] sm:$0x3] %vm72_vm0, %v417_v39 }
 0x116   :  { %v423_v41 = vld [vmem:[#allocation2] sm:$0x3] }
 0x117   :  { %v425_v42 = vsub.f32 %v423_v41, %v424_v40 }
 0x119   :  { %v426_v43 = vmul.f32 %v425_v42, %v425_v42 }
 0x11b   :  { %v428_v44 = vsel %vm72_vm0, %v426_v43, 0.0 }
 0x11c   :  { %429 = vadd.xlane.f32.xlu0 %v428_v44 }
 0x1a9   :  { %v430_v45 = vpop.xlane.xlu0 %429 }
 0x1aa   :  { %v431_v46 = vrot.slane %v430_v45, 4 }
 0x1ac   :  { %v432_v47 = vadd.f32 %v431_v46, %v430_v45 }
 0x1ae   :  { %v433_v48 = vrot.slane %v432_v47, 2 }
 0x1b0   :  { %v434_v49 = vadd.f32 %v433_v48, %v432_v47 }
 0x1b2   :  { %v435_v50 = vrot.slane %v434_v49, 1 }
 0x1b4   :  { %v436_v51 = vadd.f32 %v435_v50, %v434_v49 }
 0x1b6   :  { %462 = vpush %v436_v51 }
 0x1e7   :  { %s463_s9 = spop %462 }
 0x1e8   :  { %440 = sst [smem:[#allocation8]] %s463_s9 }
 0x1e9   :  { %529 = shalt.err (!%p526_p4)
}
 0x1ea   :  { %s540_s16 = smov [#allocation8]  }
 0x1eb   :  { %448 = dma.smem_to_hbm %s540_s16, 16, %s606_s3, [#allocation5]  }
 0x1ec   :  { %534 = dma.done.wait [#allocation5], 16  }
 0x1ed   :  { %535 = vsyncadd [#allocation5], 4294967280 }
 0x1ee   :  { %452 = sfence }
 0x1ef   :  { %453 = vsyncpa [#allocation4], 1 }
 0x1f0   :  { %454 = vsyncpa [#allocation7], 1 }
 0x1f1   :  { %455 = vsyncpa [#allocation5], 1 }

</bundles_post_ra>
